<compile_context>
chip_gen: v6e
topology: v6e:2x2x1
jax: 0.10.0
libtpu: 0.0.40
codegen_flags: <defaults>
</compile_context>

<pallas_src>
import functools

import jax
import jax.numpy as jnp
from jax.experimental import pallas as pl
from jax.experimental.pallas import tpu as pltpu


def _coot_loss_kernel(im_r_ref, s_r_ref, im_c_ref, s_c_ref, out_ref,
                      *, margin, n_valid, tq, tk):
    i = pl.program_id(0)
    j = pl.program_id(1)

    # Output row-block stays resident across the (arbitrary, last) column axis:
    # init on the first column tile, accumulate afterwards.
    @pl.when(j == 0)
    def _():
        out_ref[...] = jnp.zeros_like(out_ref)

    im_r = im_r_ref[...]   # [tq, D] rows i*tq.. of im
    s_r = s_r_ref[...]     # [tq, D] rows i*tq.. of s
    im_c = im_c_ref[...]   # [tk, D] rows j*tk.. of im
    s_c = s_c_ref[...]     # [tk, D] rows j*tk.. of s

    # diag[a] = <im[g], s[g]> for the global rows of this row block.
    # Shared by both cost_s and cost_im terms (diag(im@s.T) == diag(s@im.T)).
    diag_row = jnp.sum(im_r.astype(jnp.float32) * s_r.astype(jnp.float32),
                       axis=1, keepdims=True)                       # [tq, 1]

    # Contract both operands on the last (lane) dim -> MXU-friendly, no .T.
    dn = (((1,), (1,)), ((), ()))
    scores_st = jax.lax.dot_general(im_r, s_c, dn,
                                    preferred_element_type=jnp.float32)  # scores[p, q]
    scores_ts = jax.lax.dot_general(s_r, im_c, dn,
                                    preferred_element_type=jnp.float32)  # scores[q, p]

    cost = (jnp.maximum(margin + scores_st - diag_row, 0.0)    # cost_s terms
            + jnp.maximum(margin + scores_ts - diag_row, 0.0))  # cost_im terms

    # Drop the global diagonal and any zero-padded rows / columns (tile-local
    # iota only — never materializes an N x N mask).
    row_g = i * tq + jax.lax.broadcasted_iota(jnp.int32, (tq, tk), 0)
    col_g = j * tk + jax.lax.broadcasted_iota(jnp.int32, (tq, tk), 1)
    keep = (row_g != col_g) & (row_g < n_valid) & (col_g < n_valid)
    cost = jnp.where(keep, cost, 0.0)

    out_ref[...] += jnp.sum(cost, axis=1, keepdims=True)


def _round_up(x, k):
    return (x + k - 1) // k * k


def contrastive_loss_coot(im, s, margin=0.1, block_size=256):
    """Forward pass of ContrastiveLoss_coot (use_cuda is irrelevant on TPU)."""
    n, d = im.shape
    m, d2 = s.shape
    assert d == d2, "embedding dims must match"
    assert n == m, "ContrastiveLoss_coot expects a paired (square) batch"

    # Tile size: multiple of 8 (f32 sublane), capped by block_size / batch.
    t = min(int(block_size), _round_up(n, 8))
    t = max(8, (t // 8) * 8)
    n_pad = _round_up(n, t)

    if n_pad != n:
        pad = ((0, n_pad - n), (0, 0))
        im_p = jnp.pad(im, pad)
        s_p = jnp.pad(s, pad)
    else:
        im_p, s_p = im, s

    kernel = functools.partial(_coot_loss_kernel, margin=float(margin),
                               n_valid=n, tq=t, tk=t)

    row_sums = pl.pallas_call(
        kernel,
        out_shape=jax.ShapeDtypeStruct((n_pad, 1), jnp.float32),
        grid_spec=pltpu.PrefetchScalarGridSpec(
            num_scalar_prefetch=0,
            grid=(n_pad // t, n_pad // t),
            in_specs=[
                pl.BlockSpec((t, d), lambda i, j: (i, 0)),   # im row block
                pl.BlockSpec((t, d), lambda i, j: (i, 0)),   # s  row block
                pl.BlockSpec((t, d), lambda i, j: (j, 0)),   # im col block
                pl.BlockSpec((t, d), lambda i, j: (j, 0)),   # s  col block
            ],
            out_specs=pl.BlockSpec((t, 1), lambda i, j: (i, 0)),
        ),
        compiler_params=pltpu.CompilerParams(
            dimension_semantics=("parallel", "arbitrary")),
    )(im_p, s_p, im_p, s_p)

    # Tiny final reduction + normalization (n_pad values) outside the kernel.
    return jnp.sum(row_sums) / (n * m)


if __name__ == "__main__":
    def ref_loss(im, s, margin):
        # Pure-JAX transcription of the PyTorch forward.
        scores = im @ s.T
        diag = jnp.diagonal(scores)[:, None]
        cost_s = jnp.maximum(margin + scores - diag, 0.0)
        cost_im = jnp.maximum(margin + scores - diag.T, 0.0)
        eye = jnp.eye(scores.shape[0], dtype=bool)
        cost_s = jnp.where(eye, 0.0, cost_s)
        cost_im = jnp.where(eye, 0.0, cost_im)
        return (cost_s.sum() + cost_im.sum()) / (im.shape[0] * s.shape[0])

    key = jax.random.PRNGKey(0)
    k1, k2, k3, k4 = jax.random.split(key, 4)
    margin = 0.1

    # Case 1: small paired batch, single tile.
    n, dim = 8, 32
    im = jax.random.normal(k1, (n, dim), dtype=jnp.float32)
    s = jax.random.normal(k2, (n, dim), dtype=jnp.float32)
    loss = contrastive_loss_coot(im, s, margin=margin)
    jax.block_until_ready(loss)
    assert jnp.allclose(loss, ref_loss(im, s, margin), rtol=1e-5, atol=1e-5), (
        loss, ref_loss(im, s, margin))

    # Case 2: multi-tile grid with padding (exercises the tiled reduction path).
    n2 = 20
    im2 = jax.random.normal(k3, (n2, dim), dtype=jnp.float32)
    s2 = jax.random.normal(k4, (n2, dim), dtype=jnp.float32)
    loss2 = contrastive_loss_coot(im2, s2, margin=margin, block_size=8)
    jax.block_until_ready(loss2)
    assert jnp.allclose(loss2, ref_loss(im2, s2, margin), rtol=1e-5, atol=1e-5), (
        loss2, ref_loss(im2, s2, margin))

    print("KERNEL_OK")
</pallas_src>

<mosaic_0001>
module attributes {stable_mosaic.version = 11 : i64} {
  func.func @_coot_loss_kernel(%arg0: i32, %arg1: i32, %arg2: memref<8x32xf32, #tpu.memory_space<vmem>>, %arg3: memref<8x32xf32, #tpu.memory_space<vmem>>, %arg4: memref<8x32xf32, #tpu.memory_space<vmem>>, %arg5: memref<8x32xf32, #tpu.memory_space<vmem>>, %arg6: memref<8x1xf32, #tpu.memory_space<vmem>>) attributes {dimension_semantics = [#tpu.dimension_semantics<parallel>, #tpu.dimension_semantics<arbitrary>], iteration_bounds = array<i64: 1, 1>, scalar_prefetch = 0 : i64, scratch_operands = 0 : i64, tpu.core_type = #tpu.core_type<tc>, window_params = [{transform_indices = @transform_0, window_bounds = array<i64: 8, 32>}, {transform_indices = @transform_1, window_bounds = array<i64: 8, 32>}, {transform_indices = @transform_2, window_bounds = array<i64: 8, 32>}, {transform_indices = @transform_3, window_bounds = array<i64: 8, 32>}, {transform_indices = @transform_4, window_bounds = array<i64: 8, 1>}]} {
    %c0_i32 = arith.constant 0 : i32
    %0 = arith.cmpi eq, %arg1, %c0_i32 : i32
    %1 = arith.extui %0 : i1 to i32
    %c0_i32_0 = arith.constant 0 : i32
    %2 = arith.cmpi ne, %1, %c0_i32_0 : i32
    scf.if %2 {
      %cst_23 = arith.constant 0.000000e+00 : f32
      %47 = vector.broadcast %cst_23 : f32 to vector<8x1xf32>
      %c0_24 = arith.constant 0 : index
      %c0_25 = arith.constant 0 : index
      %48 = vector.load %arg6[%c0_24, %c0_25] : memref<8x1xf32, #tpu.memory_space<vmem>>, vector<8x1xf32>
      tpu.vector_store %arg6[%c0_24, %c0_25], %47 {strides = array<i32>} : memref<8x1xf32, #tpu.memory_space<vmem>>, vector<8x1xf32>,
    } else {
    }
    %c0 = arith.constant 0 : index
    %c0_1 = arith.constant 0 : index
    %3 = vector.load %arg2[%c0, %c0_1] : memref<8x32xf32, #tpu.memory_space<vmem>>, vector<8x32xf32>
    %c0_2 = arith.constant 0 : index
    %c0_3 = arith.constant 0 : index
    %4 = vector.load %arg3[%c0_2, %c0_3] : memref<8x32xf32, #tpu.memory_space<vmem>>, vector<8x32xf32>
    %c0_4 = arith.constant 0 : index
    %c0_5 = arith.constant 0 : index
    %5 = vector.load %arg4[%c0_4, %c0_5] : memref<8x32xf32, #tpu.memory_space<vmem>>, vector<8x32xf32>
    %c0_6 = arith.constant 0 : index
    %c0_7 = arith.constant 0 : index
    %6 = vector.load %arg5[%c0_6, %c0_7] : memref<8x32xf32, #tpu.memory_space<vmem>>, vector<8x32xf32>
    %7 = arith.mulf %3, %4 : vector<8x32xf32>
    %cst = arith.constant dense<0.000000e+00> : vector<8xf32>
    %8 = vector.multi_reduction <add>, %7, %cst [1] : vector<8x32xf32> to vector<8xf32>
    %9 = vector.shape_cast %8 : vector<8xf32> to vector<8x1xf32>
    %cst_8 = arith.constant dense<0.000000e+00> : vector<8x8xf32>
    %10 = tpu.matmul %3, %6, %cst_8 {dimension_numbers = #tpu.dot_dimension_numbers<[1], [1], [0], [0], [0, 0, 1, 0], [], []>} : vector<8x32xf32>, vector<8x32xf32>, vector<8x8xf32> -> vector<8x8xf32>
    %cst_9 = arith.constant dense<0.000000e+00> : vector<8x8xf32>
    %11 = tpu.matmul %4, %5, %cst_9 {dimension_numbers = #tpu.dot_dimension_numbers<[1], [1], [0], [0], [0, 0, 1, 0], [], []>} : vector<8x32xf32>, vector<8x32xf32>, vector<8x8xf32> -> vector<8x8xf32>
    %cst_10 = arith.constant 1.000000e-01 : f32
    %12 = vector.broadcast %cst_10 : f32 to vector<8x8xf32>
    %13 = arith.addf %12, %10 : vector<8x8xf32>
    %14 = vector.broadcast %9 : vector<8x1xf32> to vector<8x8xf32>
    %15 = arith.subf %13, %14 : vector<8x8xf32>
    %cst_11 = arith.constant 0.000000e+00 : f32
    %16 = vector.broadcast %cst_11 : f32 to vector<8x8xf32>
    %17 = arith.maximumf %15, %16 : vector<8x8xf32>
    %cst_12 = arith.constant 1.000000e-01 : f32
    %18 = vector.broadcast %cst_12 : f32 to vector<8x8xf32>
    %19 = arith.addf %18, %11 : vector<8x8xf32>
    %20 = vector.broadcast %9 : vector<8x1xf32> to vector<8x8xf32>
    %21 = arith.subf %19, %20 : vector<8x8xf32>
    %cst_13 = arith.constant 0.000000e+00 : f32
    %22 = vector.broadcast %cst_13 : f32 to vector<8x8xf32>
    %23 = arith.maximumf %21, %22 : vector<8x8xf32>
    %24 = arith.addf %17, %23 : vector<8x8xf32>
    %c8_i32 = arith.constant 8 : i32
    %25 = arith.muli %arg0, %c8_i32 : i32
    %26 = tpu.iota {dimensions = array<i32: 0>} : vector<8x8xi32>
    %27 = vector.broadcast %25 : i32 to vector<8x8xi32>
    %28 = arith.addi %27, %26 : vector<8x8xi32>
    %c8_i32_14 = arith.constant 8 : i32
    %29 = arith.muli %arg1, %c8_i32_14 : i32
    %30 = tpu.iota {dimensions = array<i32: 1>} : vector<8x8xi32>
    %31 = vector.broadcast %29 : i32 to vector<8x8xi32>
    %32 = arith.addi %31, %30 : vector<8x8xi32>
    %33 = arith.cmpi ne, %28, %32 : vector<8x8xi32>
    %c8_i32_15 = arith.constant 8 : i32
    %34 = vector.broadcast %c8_i32_15 : i32 to vector<8x8xi32>
    %35 = arith.cmpi slt, %28, %34 : vector<8x8xi32>
    %36 = arith.andi %33, %35 : vector<8x8xi1>
    %c8_i32_16 = arith.constant 8 : i32
    %37 = vector.broadcast %c8_i32_16 : i32 to vector<8x8xi32>
    %38 = arith.cmpi slt, %32, %37 : vector<8x8xi32>
    %39 = arith.andi %36, %38 : vector<8x8xi1>
    %cst_17 = arith.constant 0.000000e+00 : f32
    %40 = vector.broadcast %cst_17 : f32 to vector<8x8xf32>
    %41 = arith.select %39, %24, %40 : vector<8x8xi1>, vector<8x8xf32>
    %c0_18 = arith.constant 0 : index
    %c0_19 = arith.constant 0 : index
    %42 = vector.load %arg6[%c0_18, %c0_19] : memref<8x1xf32, #tpu.memory_space<vmem>>, vector<8x1xf32>
    %cst_20 = arith.constant dense<0.000000e+00> : vector<8xf32>
    %43 = vector.multi_reduction <add>, %41, %cst_20 [1] : vector<8x8xf32> to vector<8xf32>
    %44 = vector.shape_cast %43 : vector<8xf32> to vector<8x1xf32>
    %45 = arith.addf %42, %44 : vector<8x1xf32>
    %c0_21 = arith.constant 0 : index
    %c0_22 = arith.constant 0 : index
    %46 = vector.load %arg6[%c0_21, %c0_22] : memref<8x1xf32, #tpu.memory_space<vmem>>, vector<8x1xf32>
    tpu.vector_store %arg6[%c0_21, %c0_22], %45 {strides = array<i32>} : memref<8x1xf32, #tpu.memory_space<vmem>>, vector<8x1xf32>,
    return
  }
  func.func @transform_0(%arg0: i32, %arg1: i32) -> (i32, i32) {
    %c0_i32 = arith.constant 0 : i32
    %c0_i32_0 = arith.constant 0 : i32
    return %arg0, %c0_i32 : i32, i32
  }
  func.func @transform_1(%arg0: i32, %arg1: i32) -> (i32, i32) {
    %c0_i32 = arith.constant 0 : i32
    %c0_i32_0 = arith.constant 0 : i32
    return %arg0, %c0_i32 : i32, i32
  }
  func.func @transform_2(%arg0: i32, %arg1: i32) -> (i32, i32) {
    %c0_i32 = arith.constant 0 : i32
    %c0_i32_0 = arith.constant 0 : i32
    return %arg1, %c0_i32 : i32, i32
  }
  func.func @transform_3(%arg0: i32, %arg1: i32) -> (i32, i32) {
    %c0_i32 = arith.constant 0 : i32
    %c0_i32_0 = arith.constant 0 : i32
    return %arg1, %c0_i32 : i32, i32
  }
  func.func @transform_4(%arg0: i32, %arg1: i32) -> (i32, i32) {
    %c0_i32 = arith.constant 0 : i32
    %c0_i32_0 = arith.constant 0 : i32
    return %arg0, %c0_i32 : i32, i32
  }
}

</mosaic_0001>

<bundles_post_ra>
// kernel: tpu_custom_call.1
= control target key start
LH: loop header
LB: loop body
LE: loop exit
PB: predicated region body
PF: predicated region fallthrough
CT: control target
= control target key end

     0   :  { %9 = vsyncpa [#allocation3], 0  ;;  %s431_s0 = inlined_call_operand.hbm [shape: f32[8,32], index: 0, kind: input, shape index: {}]   ;;  %s432_s1 = inlined_call_operand.hbm [shape: f32[8,32], index: 1, kind: input, shape index: {}]   ;;  %s433_s2 = inlined_call_operand.hbm [shape: f32[8,32], index: 2, kind: input, shape index: {}]   ;;  %s434_s3 = inlined_call_operand.hbm [shape: f32[8,32], index: 3, kind: input, shape index: {}]   ;;  %s435_s4 = inlined_call_operand.vmem [shape: f32[8,1], index: 4, kind: output, shape index: {}]  }
   0x1   :  { %10 = vsyncpa [#allocation5], 0 }
   0x2   :  { %11 = vsyncpa [#allocation8], 0  ;;  %s377_s15 = smov [#allocation4]   ;;  %s378_s17 = smov [#allocation2]  }
   0x3   :  { %s28_s16 = sshll.u32 %s377_s15, 4  ;;  %s18_s18 = sshll.u32 %s378_s17, 4  ;;  %s29_s16 = int_to_ptr.vmem [resolvable:$true] %s28_s16  ;;  %s19_s18 = int_to_ptr.vmem [resolvable:$true] %s18_s18 }
   0x4   :  { %s299_s19 = scalar_lea.vmem %s29_s16, 128  ;;  %p304_p1 = scmp.lt.s32.totalorder %s29_s16, %s29_s16 }
   0x5   :  { %p300_p0 = scmp.ne.s32.totalorder %s29_s16, %s299_s19  ;;  %p305_p2 = scmp.lt.s32.totalorder %s299_s19, %s299_s19 }
   0x7   :  { %p306_p3 = por %p305_p2, %p304_p1 }
   0x9   :  { %p307_p4 = pnand %p306_p3, %p300_p0 }
   0xb   :  { %310 = shalt.err (!%p307_p4)
}
   0xc   :  { %31 = dma.hbm_to_vmem [thread:$0]  %s432_s1, 128, %s29_s16, [#allocation5]  }
   0xd   :  { %s319_s22 = scalar_lea.vmem %s19_s18, 128  ;;  %p324_p6 = scmp.lt.s32.totalorder %s19_s18, %s19_s18 }
   0xe   :  { %p320_p5 = scmp.ne.s32.totalorder %s19_s18, %s319_s22  ;;  %p325_p7 = scmp.lt.s32.totalorder %s319_s22, %s319_s22 }
  0x10   :  { %p326_p8 = por %p325_p7, %p324_p6 }
  0x12   :  { %p327_p9 = pnand %p326_p8, %p320_p5 }
  0x14   :  { %330 = shalt.err (!%p327_p9)
}
  0x15   :  { %21 = dma.hbm_to_vmem [thread:$0]  %s431_s0, 128, %s19_s18, [#allocation3]  }
  0x16   :  { %s379_s25 = smov [#allocation6]   ;;  %s380_s27 = smov [#allocation7]  }
  0x17   :  { %s38_s26 = sshll.u32 %s379_s25, 4  ;;  %s48_s28 = sshll.u32 %s380_s27, 4  ;;  %s39_s26 = int_to_ptr.vmem [resolvable:$true] %s38_s26  ;;  %s49_s28 = int_to_ptr.vmem [resolvable:$true] %s48_s28 }
  0x18   :  { %s339_s29 = scalar_lea.vmem %s39_s26, 128  ;;  %p344_p11 = scmp.lt.s32.totalorder %s39_s26, %s39_s26 }
  0x19   :  { %p340_p10 = scmp.ne.s32.totalorder %s39_s26, %s339_s29  ;;  %p345_p12 = scmp.lt.s32.totalorder %s339_s29, %s339_s29 }
  0x1b   :  { %p346_p13 = por %p345_p12, %p344_p11 }
  0x1d   :  { %p347_p0 = pnand %p346_p13, %p340_p10 }
  0x1f   :  { %350 = shalt.err (!%p347_p0)
}
  0x20   :  { %41 = dma.hbm_to_vmem [thread:$0]  %s433_s2, 128, %s39_s26, [#allocation5]  }
  0x21   :  { %s359_s5 = scalar_lea.vmem %s49_s28, 128  ;;  %p364_p2 = scmp.lt.s32.totalorder %s49_s28, %s49_s28 }
  0x22   :  { %p360_p1 = scmp.ne.s32.totalorder %s49_s28, %s359_s5  ;;  %p365_p3 = scmp.lt.s32.totalorder %s359_s5, %s359_s5 }
  0x24   :  { %p366_p4 = por %p365_p3, %p364_p2 }
  0x26   :  { %p367_p5 = pnand %p366_p4, %p360_p1 }
  0x28   :  { %370 = shalt.err (!%p367_p5)
}
  0x29   :  { %51 = dma.hbm_to_vmem [thread:$0]  %s434_s3, 128, %s49_s28, [#allocation8]  }
  0x2a   :  { %371 = dma.done.wait [#allocation3], 128  }
  0x2b   :  { %372 = vsyncadd [#allocation3], 4294967168 }
  0x2c   :  { %373 = dma.done.wait [#allocation5], 256  }
  0x2d   :  { %374 = vsyncadd [#allocation5], 4294967040 }
  0x2e   :  { %375 = dma.done.wait [#allocation8], 128  }
  0x2f   :  { %376 = vsyncadd [#allocation8], 4294967168  ;;  %vm68_vm0 = vcmask 7168   ;;  %v381_v0 = vmov 0.0   ;;  %vm382_vm1 = vmmov 0   ;;  %vm75_vm2 = vcmask 261120  }
  0x30   :  { %69 = vst.msk [vmem:[%s435_s4] sm:$0xff] %vm68_vm0, %v381_v0  ;;  %275 = vmatprep.subr.mxu0 %v381_v0  ;;  %280 = vmatprep.subr.mxu1 %v381_v0  ;;  %v73_v1 = vld [vmem:[#allocation7] sm:$0xff]  ;;  %v72_v2 = vld [vmem:[#allocation6] sm:$0xff]  ;;  %v70_v3 = vld [vmem:[#allocation2] sm:$0xff]  ;;  %v237_v7 = vlaneseq  ;;  %vm253_vm6 = vcmask 64512  }
  0x31   :  { %277 = vmatprep.mubr.msk.f32.mxu0 %vm382_vm1, %v381_v0  ;;  %282 = vmatprep.mubr.msk.f32.mxu1 %vm382_vm1, %v381_v0  ;;  %v71_v4 = vld [vmem:[#allocation4] sm:$0xff] }
  0x32   :  { %276 = vmatpush3.xpose.msk.msra.mxu0 %vm75_vm2, %v73_v1  ;;  %281 = vmatpush3.xpose.msk.msra.mxu1 %vm75_vm2, %v72_v2  ;;  %v74_v5 = vmul.f32 %v71_v4, %v70_v3  ;;  %v238_v9 = vshrl.u32 %v237_v7, 7  ;;  %v243_v10 = vand.u32 127, %v237_v7 }
  0x34   :  { %v76_v6 = vsel %vm75_vm2, %v74_v5, 0.0  ;;  %vm246_vm3 = vcmp.ne.s32.totalorder %v238_v9, %v243_v10  ;;  %vm249_vm4 = vcmp.lt.s32.totalorder %v243_v10, 8 }
  0x35   :  { %278 = vmatmul.mubr.msk.f32.vlgmr.msra.gmra.mxu0 %vm75_vm2, %v70_v3  ;;  %283 = vmatmul.mubr.msk.f32.vlgmr.msra.gmra.mxu1 %vm75_vm2, %v71_v4  ;;  %vm250_vm5 = vmand %vm246_vm3, %vm249_vm4 }
  0x36   :  { %77 = vadd.xlane.f32.xlu0 %v76_v6 }
  0x37   :  { %v252_v24 = vld [vmem:[%s435_s4] sm:$0xff] }
  0xbf   :  { %v78_v8 = vpop.xlane.xlu0 %77 }
  0xf5   :  { %v151_v11 = vpop.f32.mrf.mxu0  ;;  %v229_v12 = vpop.f32.mrf.mxu1 }
  0xf6   :  { %v152_v13 = vadd.f32 0.1, %v151_v11  ;;  %v230_v14 = vadd.f32 0.1, %v229_v12 }
  0xf7   :  { %v279_v15 = vpop.f32.mrf.mxu0  ;;  %v284_v16 = vpop.f32.mrf.mxu1 }
  0xf8   :  { %v155_v17 = vsub.f32 %v152_v13, %v78_v8  ;;  %v233_v18 = vsub.f32 %v230_v14, %v78_v8 }
  0xfa   :  { %v156_v19 = vmax.f32 %v155_v17, 0.0  ;;  %v234_v20 = vmax.f32 %v233_v18, 0.0 }
  0xfc   :  { %v235_v21 = vadd.f32 %v234_v20, %v156_v19 }
  0xfe   :  { %v251_v22 = vsel %vm250_vm5, %v235_v21, 0.0 }
  0xff   :  { %v254_v23 = vsel %vm253_vm6, %v251_v22, 0.0 }
 0x100   :  { %255 = vadd.xlane.f32.xlu0 %v254_v23 }
 0x189   :  { %v256_v25 = vpop.xlane.xlu0 %255 }
 0x18a   :  { %v257_v26 = vadd.f32 %v256_v25, %v252_v24 }
 0x18c   :  { %259 = vst.msk [vmem:[%s435_s4] sm:$0xff] %vm68_vm0, %v257_v26 }
 0x18d   :  { %264 = vsyncpa [#allocation3], 1 }
 0x18e   :  { %265 = vsyncpa [#allocation5], 1 }
 0x18f   :  { %266 = vsyncpa [#allocation8], 1 }

</bundles_post_ra>
